<compile_context>
chip_gen: v7x
topology: tpu7x:2x2x1
jax: 0.10.0
libtpu: 0.0.40
codegen_flags: <defaults>
</compile_context>

<pallas_src>
import functools

import jax
import jax.numpy as jnp
import numpy as np
from jax.experimental import pallas as pl
from jax.experimental.pallas import tpu as pltpu


# ---------------------------------------------------------------------------
# Kernel: one grid step = one (bb, T, D) batch block, fully fused forward pass.
# ---------------------------------------------------------------------------
def growth_kernel(x_ref, wi_ref, wsm_ref, wo_ref, bias_ref, o_ref, es_ref, *,
                  nhead, d_head):
    bb, T, D = x_ref.shape
    dh = d_head

    # ---- in_proj on the full (bb*T, D) slab (its bias is folded into bias_ref). ----
    x2d = x_ref[...].reshape(bb * T, D)                         # rows = (b, t)
    u2d = jnp.dot(x2d, wi_ref[...], preferred_element_type=jnp.float32)
    u2d = u2d.astype(wsm_ref.dtype)                             # smoothing compute dtype

    # ---- merged per-head exponential smoothing --------------------------------------
    # ONE (T,T) @ (T, bb*dh) matmul per head: the batch block is folded into the RHS
    # lane dimension, so Wsm[h] stays MXU-stationary and N = bb*dh instead of dh.
    # The store covers the full last dim of its scratch slice (lane-dense, no offset).
    for h in range(nhead):
        lo = h * dh
        rhs = jnp.concatenate(
            [u2d[b * T:(b + 1) * T, lo:lo + dh] for b in range(bb)], axis=1)
        es_ref[h] = jnp.dot(
            wsm_ref[h], rhs, preferred_element_type=jnp.float32).astype(es_ref.dtype)

    # ---- out_proj on the full (bb*T, D) slab; epilogue (bias add) kept in f32. ------
    s2d = jnp.concatenate(
        [jnp.concatenate([es_ref[h, :, b * dh:(b + 1) * dh] for h in range(nhead)],
                         axis=1)
         for b in range(bb)], axis=0)                           # (bb*T, D), rows (b,t)
    y2d = jnp.dot(s2d, wo_ref[...], preferred_element_type=jnp.float32)
    y = y2d.reshape(bb, T, D) + bias_ref[...][None, :, :]
    o_ref[...] = y.astype(o_ref.dtype)


# ---------------------------------------------------------------------------
# Host-side (batch-invariant) parameter folding — runs once, outside the grid.
# ---------------------------------------------------------------------------
def _fold_params(params, nhead, d_head, T, proj_dtype, smooth_dtype):
    D = nhead * d_head
    f32 = jnp.float32
    eps = 1e-6
    # alpha clamped away from 0/1 (avoids degenerate operators; benign deviation from
    # the PyTorch module only when sigmoid saturates).
    alpha = jnp.clip(
        jax.nn.sigmoid(params["smoothing_weight"].astype(f32).reshape(nhead)),
        eps, 1.0 - eps)                                                  # (H,)

    t = jnp.arange(T, dtype=f32)
    pw = t[:, None] - t[None, :]                                         # (T,T): t - j
    w_full = (1.0 - alpha)[:, None, None] * jnp.power(
        alpha[:, None, None], jnp.maximum(pw, 0.0)[None])               # no inf/NaN
    W = jnp.where(pw[None] >= 0, w_full, 0.0)                            # (H,T,T)

    # Fold the first difference (prev row; v[-1] := z0 - in_proj bias):
    #   es[t] = Wd[t,:] @ u + c[t]   with u = x @ Wi^T (no bias).
    Wd = W - jnp.concatenate([W[:, :, 1:], jnp.zeros((nhead, T, 1), f32)], axis=2)
    z0_eff = (params["z0"].astype(f32)
              - params["in_proj_b"].astype(f32).reshape(nhead, d_head))  # (H,dh)
    v0 = params["v0"].astype(f32).reshape(nhead, d_head)                 # (H,dh)
    init_w = jnp.power(alpha[:, None], t[None, :] + 1.0)                 # (H,T): a^(t+1)
    c = (-W[:, :, 0:1] * z0_eff[:, None, :]
         + init_w[:, :, None] * v0[:, None, :])                          # (H,T,dh)

    # Fold the output-side "prepend v0, drop last step": row 0 = v0, row s = es[s-1].
    Wsm = jnp.concatenate(
        [jnp.zeros((nhead, 1, T), f32), Wd[:, :T - 1, :]], axis=1)       # (H,T,T)
    crow = jnp.concatenate(
        [v0.reshape(1, D),
         jnp.transpose(c[:, :T - 1, :], (1, 0, 2)).reshape(T - 1, D)], axis=0)  # (T,D)

    WiT = params["in_proj_w"].astype(f32).T                              # (D,D)
    WoT = params["out_proj_w"].astype(f32).T                             # (D,D)
    bias_out = crow @ WoT + params["out_proj_b"].astype(f32).reshape(1, D)   # (T,D)

    return (WiT.astype(proj_dtype), Wsm.astype(smooth_dtype),
            WoT.astype(proj_dtype), bias_out)                            # bias kept f32


# ---------------------------------------------------------------------------
# Batch-block + VMEM sizing (portable across v5e/v6e/v7x — budget fits 64 MiB VMEM).
# ---------------------------------------------------------------------------
def _pick_batch_block(B, T, D, nhead, cdt_bytes, sdt_bytes, *,
                      row_target=512, vmem_budget=40 * 2**20):
    # Constants are single-buffered (pl.Buffered(1)).
    const_bytes = 2 * D * D * cdt_bytes + nhead * T * T * sdt_bytes + T * D * 4

    def step_bytes(bb):
        slab = bb * T * D
        io = 2 * slab * cdt_bytes + 2 * slab * 4    # double-buffered x block + f32 out block
        scratch = slab * cdt_bytes                  # es scratch slab (compute dtype)
        temps = 4 * slab * 4                        # u / rhs / s2d / y2d f32 temporaries
        return io + scratch + temps

    # Keep >=2 grid steps so the "parallel" batch axis can shard across v7x's 2 TCs.
    cap = B if B == 1 else B // 2
    best = 1
    for bb in range(1, cap + 1):
        if B % bb:
            continue
        if const_bytes + step_bytes(bb) > vmem_budget:
            break
        best = bb
        # ~512 projection rows per step fills the MXU M dim and amortizes the ~0.35us
        # per-step pipeline overhead (on v5e any multiple of 128 rows is already full).
        if bb * T >= row_target:
            break
    return best, const_bytes + step_bytes(best)


# ---------------------------------------------------------------------------
# Wrapper: host-side folding + pallas_call.  Returns (out, None) like the module.
# ---------------------------------------------------------------------------
def growth_layer_forward(x, params, nhead, d_head,
                         compute_dtype=jnp.bfloat16,        # bf16 projections by default
                         smoothing_dtype=jnp.float32):      # keep the ES operator in f32
    B, T, D = x.shape
    assert nhead * d_head == D

    cdt_bytes = jnp.dtype(compute_dtype).itemsize
    sdt_bytes = jnp.dtype(smoothing_dtype).itemsize

    wi_t, wsm, wo_t, bias_out = _fold_params(params, nhead, d_head, T,
                                             compute_dtype, smoothing_dtype)
    bb, vmem_est = _pick_batch_block(B, T, D, nhead, cdt_bytes, sdt_bytes)
    nb = B // bb

    x_c = x.astype(compute_dtype)      # stream x at compute precision (halves HBM bytes)

    kernel = functools.partial(growth_kernel, nhead=nhead, d_head=d_head)

    cost = pl.CostEstimate(
        flops=int(4 * B * T * D * D + 2 * B * T * T * D),
        transcendentals=0,
        bytes_accessed=int(B * T * D * (cdt_bytes + 4)
                           + 2 * D * D * cdt_bytes + nhead * T * T * sdt_bytes
                           + T * D * 4),
    )

    single = pl.Buffered(1)            # constants are DMA'd once — no double buffering
    in_specs = [
        pl.BlockSpec((bb, T, D), lambda i: (i, 0, 0)),                    # x batch block
        pl.BlockSpec((D, D), lambda i: (0, 0), pipeline_mode=single),     # in_proj W^T
        pl.BlockSpec((nhead, T, T), lambda i: (0, 0, 0),
                     pipeline_mode=single),                               # smoothing op
        pl.BlockSpec((D, D), lambda i: (0, 0), pipeline_mode=single),     # out_proj W^T
        pl.BlockSpec((T, D), lambda i: (0, 0), pipeline_mode=single),     # folded bias
    ]

    # Sized from the actual tiling; capped below v7x's 64 MiB physical VMEM.
    vmem_limit = int(min(max(2 * vmem_est, 32 * 2**20), 60 * 2**20))

    out = pl.pallas_call(
        kernel,
        out_shape=jax.ShapeDtypeStruct((B, T, D), jnp.float32),
        grid=(nb,),
        in_specs=in_specs,
        out_specs=pl.BlockSpec((bb, T, D), lambda i: (i, 0, 0)),
        scratch_shapes=[pltpu.VMEM((nhead, T, bb * d_head), compute_dtype)],
        compiler_params=pltpu.CompilerParams(
            dimension_semantics=("parallel",),
            vmem_limit_bytes=vmem_limit),
        cost_estimate=cost,
    )(x_c, wi_t, wsm, wo_t, bias_out)
    return out, None


# ---------------------------------------------------------------------------
# Pure-JAX reference matching the PyTorch module (eval mode).
# ---------------------------------------------------------------------------
def growth_layer_ref(x, params, nhead, d_head):
    B, T, D = x.shape
    v = x @ params["in_proj_w"].T + params["in_proj_b"]                  # (B,T,D)
    v = v.reshape(B, T, nhead, d_head)
    z0 = jnp.broadcast_to(params["z0"][None, None], (B, 1, nhead, d_head))
    vals = jnp.concatenate([z0, v], axis=1)
    dv = vals[:, 1:] - vals[:, :-1]                                      # (B,T,H,dh)

    a = jax.nn.sigmoid(params["smoothing_weight"])[:, 0]                 # (H,)
    t_idx = jnp.arange(T, dtype=jnp.float32)
    pw = t_idx[None, :, None] - t_idx[None, None, :]                     # (1,T,T)
    W = (1.0 - a)[:, None, None] * jnp.power(a[:, None, None], pw)
    W = jnp.where(pw >= 0, W, 0.0)                                       # (H,T,T)
    es = jnp.einsum("htj,bjhd->bthd", W, dv)
    init_w = jnp.power(a[:, None], t_idx[None, :] + 1.0)                 # (H,T)
    es = es + init_w.T[None, :, :, None] * params["v0"]

    out = jnp.concatenate(
        [jnp.broadcast_to(params["v0"], (B, 1, nhead, d_head)), es], axis=1)
    out = out.reshape(B, T + 1, D)
    out = out @ params["out_proj_w"].T + params["out_proj_b"]
    return out[:, :-1]


if __name__ == "__main__":
    B, T, d_model, nhead = 2, 8, 32, 4
    d_head = d_model // nhead

    key = jax.random.PRNGKey(0)
    ks = jax.random.split(key, 8)
    params = {
        "z0": jax.random.normal(ks[0], (nhead, d_head), jnp.float32),
        "in_proj_w": 0.1 * jax.random.normal(ks[1], (d_model, d_model), jnp.float32),
        "in_proj_b": 0.1 * jax.random.normal(ks[2], (d_model,), jnp.float32),
        "smoothing_weight": jax.random.normal(ks[3], (nhead, 1), jnp.float32),
        "v0": jax.random.normal(ks[4], (1, 1, nhead, d_head), jnp.float32),
        "out_proj_w": 0.1 * jax.random.normal(ks[5], (d_model, d_model), jnp.float32),
        "out_proj_b": 0.1 * jax.random.normal(ks[6], (d_model,), jnp.float32),
    }
    x = jax.random.normal(ks[7], (B, T, d_model), jnp.float32)

    ref = growth_layer_ref(x, params, nhead, d_head)

    # Full-f32 path — tight-ish tolerance (MXU f32 matmul roundoff headroom included).
    out_f32, attn = growth_layer_forward(x, params, nhead, d_head,
                                         compute_dtype=jnp.float32,
                                         smoothing_dtype=jnp.float32)
    out_f32 = jax.block_until_ready(out_f32)
    np.testing.assert_allclose(np.asarray(out_f32), np.asarray(ref),
                               rtol=2e-3, atol=2e-3)
    assert out_f32.shape == (B, T, d_model) and attn is None

    # Default path: bf16 projections / bf16 x / f32 smoothing — loose tolerance.
    out_bf16, _ = growth_layer_forward(x, params, nhead, d_head)
    out_bf16 = jax.block_until_ready(out_bf16)
    np.testing.assert_allclose(np.asarray(out_bf16), np.asarray(ref),
                               rtol=1e-1, atol=1e-1)

    print("KERNEL_OK")
</pallas_src>

<mosaic_0001>
module attributes {stable_mosaic.version = 11 : i64} {
  func.func @growth_kernel(%arg0: i32, %arg1: memref<1x8x32xf32, #tpu.memory_space<vmem>>, %arg2: memref<32x32xf32, #tpu.memory_space<vmem>>, %arg3: memref<4x8x8xf32, #tpu.memory_space<vmem>>, %arg4: memref<32x32xf32, #tpu.memory_space<vmem>>, %arg5: memref<8x32xf32, #tpu.memory_space<vmem>>, %arg6: memref<1x8x32xf32, #tpu.memory_space<vmem>>, %arg7: memref<4x8x8xf32, #tpu.memory_space<vmem>>) attributes {dimension_semantics = [#tpu.dimension_semantics<parallel>], iteration_bounds = array<i64: 2>, scalar_prefetch = 0 : i64, scratch_operands = 1 : i64, tpu.core_type = #tpu.core_type<tc>, window_params = [{transform_indices = @transform_0, window_bounds = array<i64: 1, 8, 32>}, {pipeline_mode = #tpu.pipeline_mode<synchronous>, transform_indices = @transform_1, window_bounds = array<i64: 32, 32>}, {pipeline_mode = #tpu.pipeline_mode<synchronous>, transform_indices = @transform_2, window_bounds = array<i64: 4, 8, 8>}, {pipeline_mode = #tpu.pipeline_mode<synchronous>, transform_indices = @transform_3, window_bounds = array<i64: 32, 32>}, {pipeline_mode = #tpu.pipeline_mode<synchronous>, transform_indices = @transform_4, window_bounds = array<i64: 8, 32>}, {transform_indices = @transform_5, window_bounds = array<i64: 1, 8, 32>}]} {
    %c0 = arith.constant 0 : index
    %c0_0 = arith.constant 0 : index
    %c0_1 = arith.constant 0 : index
    %0 = vector.load %arg1[%c0, %c0_0, %c0_1] : memref<1x8x32xf32, #tpu.memory_space<vmem>>, vector<1x8x32xf32>
    %1 = vector.shape_cast %0 : vector<1x8x32xf32> to vector<8x32xf32>
    %c0_2 = arith.constant 0 : index
    %c0_3 = arith.constant 0 : index
    %2 = vector.load %arg2[%c0_2, %c0_3] : memref<32x32xf32, #tpu.memory_space<vmem>>, vector<32x32xf32>
    %cst = arith.constant dense<0.000000e+00> : vector<8x32xf32>
    %3 = tpu.matmul %1, %2, %cst {dimension_numbers = #tpu.dot_dimension_numbers<[1], [0], [0], [1], [0, 0, 1, 1], [], []>} : vector<8x32xf32>, vector<32x32xf32>, vector<8x32xf32> -> vector<8x32xf32>
    %4 = vector.extract_strided_slice %3 {offsets = [0, 0], sizes = [8, 8], strides = [1, 1]} : vector<8x32xf32> to vector<8x8xf32>
    %c0_4 = arith.constant 0 : index
    %c0_5 = arith.constant 0 : index
    %c0_6 = arith.constant 0 : index
    %5 = vector.load %arg3[%c0_4, %c0_5, %c0_6] : memref<4x8x8xf32, #tpu.memory_space<vmem>>, vector<1x8x8xf32>
    %6 = vector.shape_cast %5 : vector<1x8x8xf32> to vector<8x8xf32>
    %cst_7 = arith.constant dense<0.000000e+00> : vector<8x8xf32>
    %7 = tpu.matmul %6, %4, %cst_7 {dimension_numbers = #tpu.dot_dimension_numbers<[1], [0], [0], [1], [0, 0, 1, 1], [], []>} : vector<8x8xf32>, vector<8x8xf32>, vector<8x8xf32> -> vector<8x8xf32>
    %c0_8 = arith.constant 0 : index
    %c0_9 = arith.constant 0 : index
    %c0_10 = arith.constant 0 : index
    %8 = vector.load %arg7[%c0_8, %c0_9, %c0_10] : memref<4x8x8xf32, #tpu.memory_space<vmem>>, vector<1x8x8xf32>
    %9 = vector.shape_cast %8 : vector<1x8x8xf32> to vector<8x8xf32>
    %10 = vector.shape_cast %7 : vector<8x8xf32> to vector<1x8x8xf32>
    tpu.vector_store %arg7[%c0_8, %c0_9, %c0_10], %10 {strides = array<i32>} : memref<4x8x8xf32, #tpu.memory_space<vmem>>, vector<1x8x8xf32>,
    %11 = vector.extract_strided_slice %3 {offsets = [0, 8], sizes = [8, 8], strides = [1, 1]} : vector<8x32xf32> to vector<8x8xf32>
    %c1 = arith.constant 1 : index
    %c0_11 = arith.constant 0 : index
    %c0_12 = arith.constant 0 : index
    %12 = vector.load %arg3[%c1, %c0_11, %c0_12] : memref<4x8x8xf32, #tpu.memory_space<vmem>>, vector<1x8x8xf32>
    %13 = vector.shape_cast %12 : vector<1x8x8xf32> to vector<8x8xf32>
    %cst_13 = arith.constant dense<0.000000e+00> : vector<8x8xf32>
    %14 = tpu.matmul %13, %11, %cst_13 {dimension_numbers = #tpu.dot_dimension_numbers<[1], [0], [0], [1], [0, 0, 1, 1], [], []>} : vector<8x8xf32>, vector<8x8xf32>, vector<8x8xf32> -> vector<8x8xf32>
    %c1_14 = arith.constant 1 : index
    %c0_15 = arith.constant 0 : index
    %c0_16 = arith.constant 0 : index
    %15 = vector.load %arg7[%c1_14, %c0_15, %c0_16] : memref<4x8x8xf32, #tpu.memory_space<vmem>>, vector<1x8x8xf32>
    %16 = vector.shape_cast %15 : vector<1x8x8xf32> to vector<8x8xf32>
    %17 = vector.shape_cast %14 : vector<8x8xf32> to vector<1x8x8xf32>
    tpu.vector_store %arg7[%c1_14, %c0_15, %c0_16], %17 {strides = array<i32>} : memref<4x8x8xf32, #tpu.memory_space<vmem>>, vector<1x8x8xf32>,
    %18 = vector.extract_strided_slice %3 {offsets = [0, 16], sizes = [8, 8], strides = [1, 1]} : vector<8x32xf32> to vector<8x8xf32>
    %c2 = arith.constant 2 : index
    %c0_17 = arith.constant 0 : index
    %c0_18 = arith.constant 0 : index
    %19 = vector.load %arg3[%c2, %c0_17, %c0_18] : memref<4x8x8xf32, #tpu.memory_space<vmem>>, vector<1x8x8xf32>
    %20 = vector.shape_cast %19 : vector<1x8x8xf32> to vector<8x8xf32>
    %cst_19 = arith.constant dense<0.000000e+00> : vector<8x8xf32>
    %21 = tpu.matmul %20, %18, %cst_19 {dimension_numbers = #tpu.dot_dimension_numbers<[1], [0], [0], [1], [0, 0, 1, 1], [], []>} : vector<8x8xf32>, vector<8x8xf32>, vector<8x8xf32> -> vector<8x8xf32>
    %c2_20 = arith.constant 2 : index
    %c0_21 = arith.constant 0 : index
    %c0_22 = arith.constant 0 : index
    %22 = vector.load %arg7[%c2_20, %c0_21, %c0_22] : memref<4x8x8xf32, #tpu.memory_space<vmem>>, vector<1x8x8xf32>
    %23 = vector.shape_cast %22 : vector<1x8x8xf32> to vector<8x8xf32>
    %24 = vector.shape_cast %21 : vector<8x8xf32> to vector<1x8x8xf32>
    tpu.vector_store %arg7[%c2_20, %c0_21, %c0_22], %24 {strides = array<i32>} : memref<4x8x8xf32, #tpu.memory_space<vmem>>, vector<1x8x8xf32>,
    %25 = vector.extract_strided_slice %3 {offsets = [0, 24], sizes = [8, 8], strides = [1, 1]} : vector<8x32xf32> to vector<8x8xf32>
    %c3 = arith.constant 3 : index
    %c0_23 = arith.constant 0 : index
    %c0_24 = arith.constant 0 : index
    %26 = vector.load %arg3[%c3, %c0_23, %c0_24] : memref<4x8x8xf32, #tpu.memory_space<vmem>>, vector<1x8x8xf32>
    %27 = vector.shape_cast %26 : vector<1x8x8xf32> to vector<8x8xf32>
    %cst_25 = arith.constant dense<0.000000e+00> : vector<8x8xf32>
    %28 = tpu.matmul %27, %25, %cst_25 {dimension_numbers = #tpu.dot_dimension_numbers<[1], [0], [0], [1], [0, 0, 1, 1], [], []>} : vector<8x8xf32>, vector<8x8xf32>, vector<8x8xf32> -> vector<8x8xf32>
    %c3_26 = arith.constant 3 : index
    %c0_27 = arith.constant 0 : index
    %c0_28 = arith.constant 0 : index
    %29 = vector.load %arg7[%c3_26, %c0_27, %c0_28] : memref<4x8x8xf32, #tpu.memory_space<vmem>>, vector<1x8x8xf32>
    %30 = vector.shape_cast %29 : vector<1x8x8xf32> to vector<8x8xf32>
    %31 = vector.shape_cast %28 : vector<8x8xf32> to vector<1x8x8xf32>
    tpu.vector_store %arg7[%c3_26, %c0_27, %c0_28], %31 {strides = array<i32>} : memref<4x8x8xf32, #tpu.memory_space<vmem>>, vector<1x8x8xf32>,
    %c0_29 = arith.constant 0 : index
    %c0_30 = arith.constant 0 : index
    %c0_31 = arith.constant 0 : index
    %32 = vector.load %arg7[%c0_29, %c0_30, %c0_31] : memref<4x8x8xf32, #tpu.memory_space<vmem>>, vector<1x8x8xf32>
    %33 = vector.shape_cast %32 : vector<1x8x8xf32> to vector<8x8xf32>
    %c1_32 = arith.constant 1 : index
    %c0_33 = arith.constant 0 : index
    %c0_34 = arith.constant 0 : index
    %34 = vector.load %arg7[%c1_32, %c0_33, %c0_34] : memref<4x8x8xf32, #tpu.memory_space<vmem>>, vector<1x8x8xf32>
    %35 = vector.shape_cast %34 : vector<1x8x8xf32> to vector<8x8xf32>
    %c2_35 = arith.constant 2 : index
    %c0_36 = arith.constant 0 : index
    %c0_37 = arith.constant 0 : index
    %36 = vector.load %arg7[%c2_35, %c0_36, %c0_37] : memref<4x8x8xf32, #tpu.memory_space<vmem>>, vector<1x8x8xf32>
    %37 = vector.shape_cast %36 : vector<1x8x8xf32> to vector<8x8xf32>
    %c3_38 = arith.constant 3 : index
    %c0_39 = arith.constant 0 : index
    %c0_40 = arith.constant 0 : index
    %38 = vector.load %arg7[%c3_38, %c0_39, %c0_40] : memref<4x8x8xf32, #tpu.memory_space<vmem>>, vector<1x8x8xf32>
    %39 = vector.shape_cast %38 : vector<1x8x8xf32> to vector<8x8xf32>
    %40 = tpu.concatenate %33, %35, %37, %39 in 1 : vector<8x8xf32>, vector<8x8xf32>, vector<8x8xf32>, vector<8x8xf32> -> vector<8x32xf32>
    %c0_41 = arith.constant 0 : index
    %c0_42 = arith.constant 0 : index
    %41 = vector.load %arg4[%c0_41, %c0_42] : memref<32x32xf32, #tpu.memory_space<vmem>>, vector<32x32xf32>
    %cst_43 = arith.constant dense<0.000000e+00> : vector<8x32xf32>
    %42 = tpu.matmul %40, %41, %cst_43 {dimension_numbers = #tpu.dot_dimension_numbers<[1], [0], [0], [1], [0, 0, 1, 1], [], []>} : vector<8x32xf32>, vector<32x32xf32>, vector<8x32xf32> -> vector<8x32xf32>
    %43 = vector.shape_cast %42 : vector<8x32xf32> to vector<1x8x32xf32>
    %c0_44 = arith.constant 0 : index
    %c0_45 = arith.constant 0 : index
    %44 = vector.load %arg5[%c0_44, %c0_45] : memref<8x32xf32, #tpu.memory_space<vmem>>, vector<8x32xf32>
    %45 = vector.shape_cast %44 : vector<8x32xf32> to vector<1x8x32xf32>
    %46 = arith.addf %43, %45 : vector<1x8x32xf32>
    %c0_46 = arith.constant 0 : index
    %c0_47 = arith.constant 0 : index
    %c0_48 = arith.constant 0 : index
    %47 = vector.load %arg6[%c0_46, %c0_47, %c0_48] : memref<1x8x32xf32, #tpu.memory_space<vmem>>, vector<1x8x32xf32>
    tpu.vector_store %arg6[%c0_46, %c0_47, %c0_48], %46 {strides = array<i32>} : memref<1x8x32xf32, #tpu.memory_space<vmem>>, vector<1x8x32xf32>,
    return
  }
  func.func @transform_0(%arg0: i32) -> (i32, i32, i32) {
    %c0_i32 = arith.constant 0 : i32
    %c0_i32_0 = arith.constant 0 : i32
    %c0_i32_1 = arith.constant 0 : i32
    return %arg0, %c0_i32, %c0_i32_0 : i32, i32, i32
  }
  func.func @transform_1(%arg0: i32) -> (i32, i32) {
    %c0_i32 = arith.constant 0 : i32
    %c0_i32_0 = arith.constant 0 : i32
    %c0_i32_1 = arith.constant 0 : i32
    return %c0_i32, %c0_i32_0 : i32, i32
  }
  func.func @transform_2(%arg0: i32) -> (i32, i32, i32) {
    %c0_i32 = arith.constant 0 : i32
    %c0_i32_0 = arith.constant 0 : i32
    %c0_i32_1 = arith.constant 0 : i32
    %c0_i32_2 = arith.constant 0 : i32
    return %c0_i32, %c0_i32_0, %c0_i32_1 : i32, i32, i32
  }
  func.func @transform_3(%arg0: i32) -> (i32, i32) {
    %c0_i32 = arith.constant 0 : i32
    %c0_i32_0 = arith.constant 0 : i32
    %c0_i32_1 = arith.constant 0 : i32
    return %c0_i32, %c0_i32_0 : i32, i32
  }
  func.func @transform_4(%arg0: i32) -> (i32, i32) {
    %c0_i32 = arith.constant 0 : i32
    %c0_i32_0 = arith.constant 0 : i32
    %c0_i32_1 = arith.constant 0 : i32
    return %c0_i32, %c0_i32_0 : i32, i32
  }
  func.func @transform_5(%arg0: i32) -> (i32, i32, i32) {
    %c0_i32 = arith.constant 0 : i32
    %c0_i32_0 = arith.constant 0 : i32
    %c0_i32_1 = arith.constant 0 : i32
    return %arg0, %c0_i32, %c0_i32_0 : i32, i32, i32
  }
}

</mosaic_0001>

<bundles_post_ra>
// kernel: tpu_custom_call.1
= control target key start
LH: loop header
LB: loop body
LE: loop exit
PB: predicated region body
PF: predicated region fallthrough
CT: control target
= control target key end

     0   :  { %10 = vsyncpa [#allocation4], 0  ;;  %s1602_s0 = inlined_call_operand.hbm [shape: f32[2,8,32], index: 0, kind: input, shape index: {}]   ;;  %s1603_s1 = inlined_call_operand.hbm [shape: f32[32,32], index: 1, kind: input, shape index: {}]   ;;  %s1604_s2 = inlined_call_operand.hbm [shape: f32[4,8,8], index: 2, kind: input, shape index: {}]   ;;  %s1605_s3 = inlined_call_operand.hbm [shape: f32[32,32], index: 3, kind: input, shape index: {}]   ;;  %s1606_s4 = inlined_call_operand.vmem [shape: f32[8,32], index: 4, kind: input, shape index: {}]   ;;  %s1607_s5 = inlined_call_operand.hbm [shape: f32[2,8,32], index: 5, kind: output, shape index: {}]  }
   0x1   :  { %12 = vsyncpa [#allocation4 + $0x1], 0 }
   0x2   :  { %13 = vsyncpa [#allocation7], 0 }
   0x3   :  { %14 = vsyncpa [#allocation10], 0 }
   0x4   :  { %15 = vsyncpa [#allocation5], 0 }
   0x5   :  { %17 = vsyncpa [#allocation5 + $0x1], 0  ;;  %s1314_s18 = smov 0   ;;  %s1316_s19 = smov 0  }
   0x6   :  { %s1318_s20 = smov 0   ;;  %s1320_s21 = smov 0  }
   0x7 LB: > { %s1335_s22 = sadd.s32 4294967295, %s1266_s21   ;;  %s894_s23 = sadd.s32 4294967294, %s1266_s21   ;;  %s1266_s21 = sphi %s1320_s21, %s1630_s21   ;;  %s1262_s20 = sphi %s1318_s20, %s1629_s20   ;;  %s1258_s19 = sphi %s1316_s19, %s1628_s19   ;;  %s1254_s18 = sphi %s1314_s18, %s1627_s18  }
   0x8   : > { %p43_p0 = scmp.ne.s32.totalorder %s1258_s19, %s1254_s18  ;;  %p1608_p1 = scmp.eq.s32.totalorder %s1335_s22, 0 }
   0x9   : > { %p157_p3 = scmp.eq.s32.totalorder %s894_s23, 1  ;;  %p895_p5 = scmp.ge.s32.totalorder %s1266_s21, 1 }
   0xa   : > { %p1344_p4 = por %p1608_p1, %p43_p0  ;;  %p164_p7 = scmp.lt.s32.totalorder %s1266_s21, 3 }
   0xb   : > { %p1349_p6 = por %p157_p3, %p43_p0  ;;  %s1268_s27 = smov [#allocation6]  }
   0xc   : > { %s1611_s24 = scalar_select %p1344_p4, 1, 0 }
   0xd   : > { %s1612_s25 = scalar_select %p1349_p6, 1, 0 }
   0xe   : > { %p1354_p8 = pnand %p895_p5, %p164_p7  ;;  %s176_s28 = sshll.u32 %s1268_s27, 4  ;;  %s1358_s28 = int_to_ptr.vmem [resolvable:$true] %s176_s28 }
   0xf   : > { %s1269_s30 = smov [#allocation8]   ;;  %s1270_s7 = smov [#allocation9]  }
  0x10   : > { %s1613_s26 = scalar_select %p1354_p8, 1, 0 }
  0x11   : > { %p1006_p9 = pneg %p1354_p8  ;;  %s189_s6 = sshll.u32 %s1269_s30, 4  ;;  %s1369_s6 = int_to_ptr.vmem [resolvable:$true] %s189_s6 }
  0x12   : > { %s1371_s8 = sshll.u32 %s1270_s7, 4  ;;  %s1078_s11 = scalar_lea.hbm %s1603_s1, 512  ;;  %s203_s8 = int_to_ptr.vmem [resolvable:$true] %s1371_s8 }
  0x13   : > { %p1365_p11 = pnand %p1006_p9, %p1608_p1  ;;  %p1079_p12 = scmp.ne.s32.totalorder %s1603_s1, %s1078_s11 }
  0x14   : > { %p1085_p5 = scmp.lt.u32.totalorder %s1078_s11, %s1603_s1 }
  0x15   : > { %p1381_p13 = pneg %p1365_p11 }
  0x17   : > { %p1081_p0 = pnand %p1381_p13, %p1079_p12 }
  0x19   : > { %p1082_p3 = pneg %p1081_p0 }
  0x1b   : > { %p1087_p7 = pnand %p1085_p5, %p1082_p3 }
  0x1d   : > { %1090 = shalt.err (!%p1087_p7)
}
  0x1e   : > { %s1091_s17 = scalar_lea.vmem %s1358_s28, 512  ;;  %p1099_p2 = scmp.lt.s32.totalorder %s1358_s28, %s1358_s28 }
  0x1f   : > { %p1092_p9 = scmp.ne.s32.totalorder %s1358_s28, %s1091_s17  ;;  %p1100_p6 = scmp.lt.s32.totalorder %s1091_s17, %s1091_s17 }
  0x21   : > { %p1094_p10 = pnand %p1092_p9, %p1381_p13  ;;  %p1101_p12 = por %p1100_p6, %p1099_p2 }
  0x23   : > { %p1095_p1 = pneg %p1094_p10 }
  0x25   : > { %p1102_p0 = pnand %p1101_p12, %p1095_p1 }
  0x27   : > { %1105 = shalt.err (!%p1102_p0)
}
  0x28   : > { %s1271_s23 = smov 128   ;;  %s1272_s27 = smov 8  }
  0x29   : > { %1009 = dma.hbm_to_vmem [thread:$0]  (!%p1365_p11), %s1603_s1, 512, %s1358_s28, [#allocation7], %s1271_s23, %s1271_s23, %s1272_s27  }
  0x2a   : > { %s1106_s11 = scalar_lea.hbm %s1604_s2, 512 }
  0x2b   : > { %p1107_p1 = scmp.ne.s32.totalorder %s1604_s2, %s1106_s11  ;;  %p1113_p10 = scmp.lt.u32.totalorder %s1106_s11, %s1604_s2 }
  0x2d   : > { %p1109_p2 = pnand %p1107_p1, %p1381_p13 }
  0x2f   : > { %p1110_p6 = pneg %p1109_p2 }
  0x31   : > { %p1115_p3 = pnand %p1113_p10, %p1110_p6 }
  0x33   : > { %1118 = shalt.err (!%p1115_p3)
}
  0x34   : > { %s1119_s28 = scalar_lea.vmem %s1369_s6, 512  ;;  %p1127_p12 = scmp.lt.s32.totalorder %s1369_s6, %s1369_s6 }
  0x35   : > { %p1120_p5 = scmp.ne.s32.totalorder %s1369_s6, %s1119_s28  ;;  %p1128_p0 = scmp.lt.s32.totalorder %s1119_s28, %s1119_s28 }
  0x37   : > { %p1122_p7 = pnand %p1120_p5, %p1381_p13  ;;  %p1129_p1 = por %p1128_p0, %p1127_p12 }
  0x39   : > { %p1123_p9 = pneg %p1122_p7 }
  0x3b   : > { %p1130_p2 = pnand %p1129_p1, %p1123_p9 }
  0x3d   : > { %1133 = shalt.err (!%p1130_p2)
}
  0x3e   : > { %1012 = dma.hbm_to_vmem [thread:$0]  (!%p1365_p11), %s1604_s2, 512, %s1369_s6, [#allocation7], %s1271_s23, %s1271_s23, %s1272_s27  }
  0x3f   : > { %s1134_s10 = scalar_lea.hbm %s1605_s3, 512 }
  0x40   : > { %p1135_p6 = scmp.ne.s32.totalorder %s1605_s3, %s1134_s10  ;;  %p1141_p5 = scmp.lt.u32.totalorder %s1134_s10, %s1605_s3 }
  0x42   : > { %p1137_p10 = pnand %p1135_p6, %p1381_p13 }
  0x44   : > { %p1138_p3 = pneg %p1137_p10 }
  0x46   : > { %p1143_p7 = pnand %p1141_p5, %p1138_p3 }
  0x48   : > { %1146 = shalt.err (!%p1143_p7)
}
  0x49   : > { %s1147_s16 = scalar_lea.vmem %s203_s8, 512  ;;  %p1155_p1 = scmp.lt.s32.totalorder %s203_s8, %s203_s8 }
  0x4a   : > { %p1148_p9 = scmp.ne.s32.totalorder %s203_s8, %s1147_s16  ;;  %p1156_p2 = scmp.lt.s32.totalorder %s1147_s16, %s1147_s16 }
  0x4c   : > { %p1150_p12 = pnand %p1148_p9, %p1381_p13  ;;  %p1157_p4 = por %p1156_p2, %p1155_p1 }
  0x4e   : > { %p1151_p0 = pneg %p1150_p12 }
  0x50   : > { %p1158_p8 = pnand %p1157_p4, %p1151_p0 }
  0x52   : > { %1161 = shalt.err (!%p1158_p8)
}
  0x53   : > { %1015 = dma.hbm_to_vmem [thread:$0]  (!%p1365_p11), %s1605_s3, 512, %s203_s8, [#allocation10], %s1271_s23, %s1271_s23, %s1272_s27  }
  0x54   : > { %s1454_s14 = sadd.s32 1, %s1266_s21   ;;  %s30_s17 = sadd.s32 1, %s1262_s20 }
  0x55   : > { %s27_s29 = ssub.s32 %s1266_s21, %s1454_s14  ;;  %p37_p8 = scmp.ne.s32.totalorder %s1262_s20, %s1258_s19 }
  0x56   : > { %p28_p4 = scmp.eq.s32.totalorder %s27_s29, 0  ;;  %p38_p13 = scmp.eq.s32.totalorder %s1266_s21, 0 }
  0x57   : > { %p1027_p6 = scmp.lt.s32.totalorder %s1266_s21, 2  ;;  %p1616_p3 = scmp.eq.s32.totalorder %s1335_s22, 1 }
  0x58   : > { %s1464_s30 = scalar_select %p28_p4, %s1262_s20, %s30_s17  }
  0x59   : > { %p39_p10 = por %p38_p13, %p37_p8  ;;  %p1468_p5 = por %p1616_p3, %p37_p8 }
  0x5a   : > { %s219_s9 = sand.u32 1, %s1262_s20   ;;  %s901_s10 = sshll.u32 %s1266_s21, 7 }
  0x5b   : > { %s900_s8 = sshll.u32 %s219_s9, 3  ;;  %s1477_s11 = scalar_lea.hbm %s1602_s0, %s901_s10 }
  0x5c   : > { %s223_s12 = scalar_lea.vmem [#allocation3], %s900_s8  ;;  %p1479_p11 = pnand %p1027_p6, %p39_p10 }
  0x5d   : > { %s230_s13 = sshll.u32 %s223_s12, 4  ;;  %s220_s16 = scalar_lea.sflag [#allocation4], %s219_s9  ;;  %s1483_s13 = int_to_ptr.vmem [resolvable:$true] %s230_s13 }
  0x5e   : > { %s1162_s6 = scalar_lea.hbm %s1477_s11, 128  ;;  %p1164_p9 = pneg %p1479_p11 }
  0x5f   : > { %p1163_p7 = scmp.ne.s32.totalorder %s1477_s11, %s1162_s6  ;;  %s1167_s17 = scalar_lea.hbm %s1602_s0, 256 }
  0x60   : > { %p1168_p1 = scmp.lt.u32.totalorder %s1477_s11, %s1602_s0  ;;  %p1169_p2 = scmp.lt.u32.totalorder %s1167_s17, %s1162_s6 }
  0x61   : > { %p1165_p12 = pnand %p1164_p9, %p1163_p7  ;;  %p1171_p8 = scmp.lt.u32.totalorder %s1162_s6, %s1477_s11 }
  0x62   : > { %p1170_p4 = por %p1169_p2, %p1168_p1 }
  0x63   : > { %p1166_p0 = pneg %p1165_p12 }
  0x64   : > { %p1172_p13 = por %p1171_p8, %p1170_p4 }
  0x66   : > { %p1173_p6 = pnand %p1172_p13, %p1166_p0 }
  0x68   : > { %1176 = shalt.err (!%p1173_p6)
}
  0x69   : > { %s1177_s9 = scalar_lea.vmem %s1483_s13, 128  ;;  %s1273_s23 = smov [#allocation3]  }
  0x6a   : > { %p1178_p10 = scmp.ne.s32.totalorder %s1483_s13, %s1177_s9  ;;  %s1182_s27 = sshll.u32 %s1273_s23, 4  ;;  %s1183_s27 = int_to_ptr.vmem [resolvable:$false] %s1182_s27 }
  0x6b   : > { %s1184_s12 = scalar_lea.vmem %s1183_s27, 256  ;;  %p1185_p12 = scmp.lt.s32.totalorder %s1483_s13, %s1183_s27 }
  0x6c   : > { %p1180_p3 = pnand %p1178_p10, %p1164_p9  ;;  %p1186_p1 = scmp.lt.s32.totalorder %s1184_s12, %s1177_s9 }
  0x6e   : > { %p1181_p7 = pneg %p1180_p3  ;;  %p1187_p2 = por %p1186_p1, %p1185_p12 }
  0x70   : > { %p1188_p4 = pnand %p1187_p2, %p1181_p7 }
  0x72   : > { %1191 = shalt.err (!%p1188_p4)
}
  0x73   : > { %1019 = dma.hbm_to_vmem [thread:$0]  (!%p1479_p11), %s1477_s11, 128, %s1483_s13, %s220_s16  }
  0x74   : > { %p1619_p0 = scmp.ne.s32.totalorder %s1613_s26, 0 }
  0x75   : > { %s1513_s6 = sand.u32 (!%p1619_p0), 1, %s1258_s19   ;;  %p1620_p9 = scmp.ne.s32.totalorder (!%p1619_p0), %s1611_s24, 0 }
  0x76   : > { %239 = sbr.rel (%p1619_p0) target bundleno = 1041 (0x411), region = 40  ;;  %s903_s28 = sshll.u32 (!%p1619_p0), %s1513_s6, 3 }
  0x77   : > { %s242_s29 = scalar_lea.sflag (!%p1619_p0), [#allocation4], %s1513_s6  ;;  %s245_s17 = scalar_lea.vmem (!%p1619_p0), [#allocation3], %s903_s28 }
  0x7d   : > { %1237 = dma.done.wait (%p1620_p9), %s242_s29, 128  }
  0x7e   : > { %1239 = vsyncadd (%p1620_p9), %s242_s29, 4294967168  ;;  %p1621_p11 = scmp.eq.s32.totalorder %s1335_s22, 0 }
  0x80   : > { %1241 = dma.done.wait (%p1621_p11), [#allocation7], 1024   ;;  %p1622_p8 = pmov %p1621_p11 }
  0x82   : > { %1243 = vsyncadd (%p1622_p8), [#allocation7], 4294966272  ;;  %p1623_p13 = pmov %p1622_p8 }
  0x83   : > { %p1624_p6 = pmov %p1622_p8 }
  0x84   : > { %1245 = dma.done.wait (%p1623_p13), [#allocation10], 512  }
  0x85   : > { %1247 = vsyncadd (%p1624_p6), [#allocation10], 4294966784  ;;  %v1274_v0 = vmov 0.0|0.0   ;;  %vm1275_vm0 = vmmov 0   ;;  %v1276_v1 = vmov 0.0   ;;  %v285_v2 = vld [vmem:[#allocation6] sm:$0xff] }
  0x86   : > { %978 = vmatprep.subr.bf16.mxu0 %v1274_v0  ;;  %944 = vmatprep.mubr.msk.f32.mxu0 %vm1275_vm0, %v1276_v1  ;;  %v286_v3 = vld [vmem:[#allocation6 + $0x8] sm:$0xff]  ;;  %v287_v4 = vld [vmem:[#allocation6 + $0x10] sm:$0xff]  ;;  %v288_v6 = vld [vmem:[#allocation6 + $0x18] sm:$0xff]  ;;  %vm289_vm1 = vcmask 261120   ;;  %vm364_vm2 = vcmask 64512   ;;  %s1277_s24 = smov 104  }
  0x87   : > { %952 = vmatprep.subr.mxu1 %v1276_v1  ;;  %954 = vmatprep.mubr.msk.f32.mxu1 %vm1275_vm0, %v1276_v1  ;;  %v979_v5 = vpack.c.bf16 %v286_v3, %v285_v2  ;;  %v982_v7 = vpack.c.bf16 %v288_v6, %v287_v4  ;;  %v284_v8 = vld [vmem:[%s245_s17] sm:$0xff]  ;;  %v363_v10 = vld [vmem:[#allocation8] sm:$0xff]  ;;  %s1278_s26 = smov 120   ;;  %s1279_s11 = smov 112   ;;  %v440_v12 = vld [vmem:[#allocation8 + $0x8] sm:$0xff]  ;;  %vm697_vm3 = vcmask 130048  }
  0x88   : > { %v601_v15 = vld [vmem:[#allocation8 + $0x18] sm:$0xff]  ;;  %v521_v16 = vld [vmem:[#allocation8 + $0x10] sm:$0xff]  ;;  %v701_v20 = vld [vmem:[#allocation9] sm:$0xff]  ;;  %s1280_s13 = smov 8   ;;  %s1281_s15 = smov 16   ;;  %vm699_vm4 = vcmask 195584  }
  0x89   : > { %980 = vmatpush3.bf16.msra.mxu0 %v979_v5  ;;  %v702_v21 = vld [vmem:[#allocation9 + $0x8] sm:$0xff]  ;;  %v703_v23 = vld [vmem:[#allocation9 + $0x10] sm:$0xff]  ;;  %v704_v24 = vld [vmem:[#allocation9 + $0x18] sm:$0xff]  ;;  %s1282_s16 = smov 24   ;;  %s915_s9 = sshll.u32 %s1335_s22, 7 }
  0x8a   : > { %981 = vmatprep.subr.bf16.mxu0 %v1274_v0  ;;  %v985_v22 = vpack.c.bf16 %v702_v21, %v701_v20  ;;  %v988_v25 = vpack.c.bf16 %v704_v24, %v703_v23  ;;  %v778_v42 = vld [vmem:[%s1606_s4] sm:$0xff]  ;;  %s283_s23 = scalar_lea.vmem [#allocation11], %s903_s28  ;;  %s1557_s17 = scalar_lea.hbm %s1607_s5, %s915_s9 }
  0x8b   : > { %s795_s27 = sshll.u32 %s283_s23, 4  ;;  %s1283_s28 = smov [#allocation11]   ;;  %s1559_s27 = int_to_ptr.vmem [resolvable:$true] %s795_s27 }
  0x8c   : > { %s1192_s22 = scalar_lea.vmem %s1559_s27, 128 }
  0x8d   : > { %983 = vmatpush3.bf16.msra.mxu0 %v982_v7  ;;  %p1193_p10 = scmp.ne.s32.totalorder %s1559_s27, %s1192_s22 }
  0x8e   : > { %947 = vmatprep.subr.mxu0 %v1276_v1 }
  0x8f   : > { %p1194_p3 = pnand %p1193_p10, %p1468_p5 }
  0x90   : > { %945 = vmatmul.mubr.msk.f32.vlgmr.msra.gmra.mrb[0].mxu0 %vm289_vm1, %v284_v8 }
  0x91   : > { %949 = vmatprep.mubr.msk.f32.mxu0 %vm1275_vm0, %v1276_v1  ;;  %p1195_p7 = pneg %p1194_p3 }
 0x163   : > { %v359_v9 = vpop.f32.mrb[0].mxu0 }
 0x164   : > { %602 = vrot.lane.b32.xlu1 %v359_v9, %s1277_s24  ;;  %442 = vrot.lane.b32.xlu0 %v359_v9, %s1278_s26  ;;  %v946_v11 = vpop.f32.mrb[1].mxu0  ;;  %s782_s24 = scalar_lea.sflag [#allocation5], %s1513_s6  ;;  %s1196_s26 = sshll.u32 %s1283_s28, 4  ;;  %s1197_s26 = int_to_ptr.vmem [resolvable:$false] %s1196_s26 }
 0x165   : > { %948 = vmatpush3.msra.mxu0 %v359_v9  ;;  %p1199_p12 = scmp.lt.s32.totalorder %s1559_s27, %s1197_s26 }
 0x166   : > { %962 = vmatprep.subr.mxu0 %v1276_v1  ;;  %950 = vmatmul.mubr.msk.f32.vlgmr.msra.gmra.mrb[2].mxu0 %vm364_vm2, %v363_v10 }
 0x167   : > { %964 = vmatprep.mubr.msk.f32.mxu0 %vm1275_vm0, %v1276_v1 }
 0x168   : > { %522 = vrot.lane.b32.xlu0 %v359_v9, %s1279_s11  ;;  %s1198_s11 = scalar_lea.vmem %s1197_s26, 256 }
 0x169   : > { %p1200_p1 = scmp.lt.s32.totalorder %s1198_s11, %s1192_s22 }
 0x16b   : > { %p1201_p2 = por %p1200_p1, %p1199_p12 }
 0x16d   : > { %p1202_p4 = pnand %p1201_p2, %p1195_p7 }
 0x1d6   : > { %v603_v13 = vpop.permute.xlu1 %602  ;;  %v443_v14 = vpop.permute.xlu0 %442 }
 0x1d7   : > { %953 = vmatpush3.msra.mxu1 %v443_v14  ;;  %963 = vmatpush3.msra.mxu0 %v603_v13 }
 0x1d8   : > { %955 = vmatmul.mubr.msk.f32.vlgmr.msra.gmra.mrb[0].mxu1 %vm364_vm2, %v440_v12  ;;  %957 = vmatprep.subr.mxu1 %v1276_v1 }
 0x1d9   : > { %959 = vmatprep.mubr.msk.f32.mxu1 %vm1275_vm0, %v1276_v1  ;;  %965 = vmatmul.mubr.msk.f32.vlgmr.msra.gmra.mrb[4].mxu0 %vm364_vm2, %v601_v15 }
 0x1da   : > { %v523_v17 = vpop.permute.xlu0 %522 }
 0x1db   : > { %958 = vmatpush3.msra.mxu1 %v523_v17 }
 0x1dc   : > { %960 = vmatmul.mubr.msk.f32.vlgmr.msra.gmra.mrb[2].mxu1 %vm364_vm2, %v521_v16  ;;  %984 = vmatprep.subr.bf16.mxu1 %v1274_v0 }
 0x1dd   : > { %975 = vmatprep.mubr.msk.f32.mxu1 %vm1275_vm0, %v1276_v1  ;;  %986 = vmatpush3.bf16.msra.mxu1 %v985_v22 }
 0x1de   : > { %987 = vmatprep.subr.bf16.mxu1 %v1274_v0 }
 0x1e1   : > { %989 = vmatpush3.bf16.msra.mxu1 %v988_v25 }
 0x239   : > { %v434_v18 = vpop.f32.mrb[2].mxu0 }
 0x23a   : > { %438 = vst.msk [vmem:[#allocation2] sm:$0xff] %vm364_vm2, %v434_v18  ;;  %v951_v19 = vpop.f32.mrb[3].mxu0 }
 0x241   : > { %v680_v36 = vld [vmem:[#allocation2] sm:$0xff] }
 0x2ab   : > { %v514_v26 = vpop.f32.mrb[0].mxu1 }
 0x2ac   : > { %519 = vst.msk [vmem:[#allocation2 + $0x8] sm:$0xff] %vm364_vm2, %v514_v26  ;;  %v956_v27 = vpop.f32.mrb[1].mxu1  ;;  %v674_v28 = vpop.f32.mrb[4].mxu0 }
 0x2ad   : > { %679 = vst.msk [vmem:[#allocation2 + $0x18] sm:$0xff] %vm364_vm2, %v674_v28  ;;  %v966_v29 = vpop.f32.mrb[5].mxu0 }
 0x2af   : > { %v594_v30 = vpop.f32.mrb[2].mxu1 }
 0x2b0   : > { %599 = vst.msk [vmem:[#allocation2 + $0x10] sm:$0xff] %vm364_vm2, %v594_v30  ;;  %v961_v31 = vpop.f32.mrb[3].mxu1 }
 0x2b3   : > { %v681_v32 = vld [vmem:[#allocation2 + $0x8] sm:$0xff] }
 0x2b4   : > { %685 = vrot.lane.b32.xlu1 %v681_v32, %s1280_s13  ;;  %v683_v33 = vld [vmem:[#allocation2 + $0x18] sm:$0xff] }
 0x2b7   : > { %v682_v34 = vld [vmem:[#allocation2 + $0x10] sm:$0xff] }
 0x2b8   : > { %689 = vrot.lane.b32.xlu0 %v682_v34, %s1281_s15  ;;  %693 = vrot.lane.b32.xlu1 %v683_v33, %s1282_s16 }
 0x326   : > { %v686_v35 = vpop.permute.xlu1 %685 }
 0x327   : > { %v696_v37 = vsel %vm364_vm2, %v680_v36, %v686_v35 }
 0x32a   : > { %v690_v38 = vpop.permute.xlu0 %689  ;;  %v694_v39 = vpop.permute.xlu1 %693 }
 0x32b   : > { %v698_v40 = vsel %vm697_vm3, %v696_v37, %v690_v38 }
 0x32c   : > { %v700_v41 = vsel %vm699_vm4, %v698_v40, %v694_v39 }
 0x32d   : > { %976 = vmatmul.mubr.msk.f32.vlgmr.msra.gmra.mrb[4].mxu1 %vm289_vm1, %v700_v41 }
 0x400   : > { %v774_v43 = vpop.f32.mrb[4].mxu1 }
 0x401   : > { %v779_v44 = vadd.f32 %v778_v42, %v774_v43  ;;  %v977_v45 = vpop.f32.mrb[5].mxu1 }
 0x403   : > { %780 = vst.msk [vmem:[%s283_s23] sm:$0xff] %vm289_vm1, %v779_v44 }
 0x404   : > { %1205 = shalt.err (!%p1202_p4)
}
 0x405   : > { %s1206_s6 = scalar_lea.hbm %s1557_s17, 128  ;;  %s1210_s16 = scalar_lea.hbm %s1607_s5, 256 }
 0x406   : > { %p1207_p0 = scmp.ne.s32.totalorder %s1557_s17, %s1206_s6  ;;  %p1211_p8 = scmp.lt.u32.totalorder %s1557_s17, %s1607_s5 }
 0x407   : > { %p1212_p13 = scmp.lt.u32.totalorder %s1210_s16, %s1206_s6  ;;  %p1214_p10 = scmp.lt.u32.totalorder %s1206_s6, %s1557_s17 }
 0x408   : > { %p1208_p9 = pnand %p1207_p0, %p1468_p5 }
 0x409   : > { %p1213_p6 = por %p1212_p13, %p1211_p8 }
 0x40a   : > { %p1209_p11 = pneg %p1208_p9 }
 0x40b   : > { %p1215_p3 = por %p1214_p10, %p1213_p6 }
 0x40d   : > { %p1216_p7 = pnand %p1215_p3, %p1209_p11 }
 0x40f   : > { %1219 = shalt.err (!%p1216_p7)
}
 0x410   : > { %1004 = dma.vmem_to_hbm [thread:$0]  (%p1468_p5), %s1559_s27, 128, %s1557_s17, %s782_s24  }
 0x411 PF: > { %s807_s9 = sand.u32 1, %s1254_s18   ;;  %p1625_p12 = scmp.ne.s32.totalorder %s1612_s25, 0 }
 0x412   : > { %p1626_p1 = scmp.ge.s32.totalorder %s1266_s21, 2  ;;  %s808_s23 = scalar_lea.sflag [#allocation5], %s807_s9 }
 0x414   : > { %p1021_p2 = pnand %p1626_p1, %p1625_p12 }
 0x416   : > { %1249 = dma.done.wait (!%p1021_p2), %s808_s23, 128  }
 0x417   : > { %1251 = vsyncadd (!%p1021_p2), %s808_s23, 4294967168  ;;  %p20_p4 = scmp.ge.s32.totalorder %s1454_s14, 4   ;;  %s1627_s18 = smov %s1258_s19 }
 0x418   : > { %s1628_s19 = smov %s1262_s20  ;;  %s1629_s20 = smov %s1464_s30 }
 0x419   : > { %s1630_s21 = smov %s1454_s14  ;;  %22 = sbr.rel (!%p20_p4) target bundleno = 7 (0x7), region = 103 }
 0x420   :  { %813 = vsyncpa [#allocation4], 1 }
 0x421   :  { %815 = vsyncpa [#allocation4 + $0x1], 1 }
 0x422   :  { %816 = vsyncpa [#allocation7], 1 }
 0x423   :  { %817 = vsyncpa [#allocation10], 1 }
 0x424   :  { %818 = vsyncpa [#allocation5], 1 }
 0x425   :  { %820 = vsyncpa [#allocation5 + $0x1], 1 }

</bundles_post_ra>
